<compile_context>
chip_gen: v6e
topology: v6e:2x2x1
jax: 0.10.0
libtpu: 0.0.40
codegen_flags: <defaults>
</compile_context>

<pallas_src>
import functools

import jax
import jax.numpy as jnp
from jax.experimental import pallas as pl
from jax.experimental.pallas import tpu as pltpu

_MIB = 1024 * 1024


def _round_up(x, m):
    return (x + m - 1) // m * m


def _attn_kernel(q_ref, k_ref, v_ref, wqt_ref, bq_ref, mask_ref, out_ref,
                 *attn_refs, needs_mask):
    # Leading batch dim is squeezed by the BlockSpecs, so every ref is 2-D.
    q = q_ref[...]        # (TQ, d_query)
    k = k_ref[...]        # (Lk_pad, dk_pad)   resident across the Lq-tile axis
    v = v_ref[...]        # (Lk_pad, dv_pad)   resident across the Lq-tile axis
    wqt = wqt_ref[...]    # (d_query, dk_pad)  pre-transposed Linear weight
    bq = bq_ref[...]      # (1, dk_pad)

    # Query projection (Linear d_query -> d_key); f32 accumulation on the MXU.
    q_proj = jnp.dot(q, wqt, preferred_element_type=jnp.float32) + bq      # (TQ, dk_pad)

    # similarity = q' @ k^T as a last-dim contraction (no materialized transpose).
    s = jax.lax.dot_general(q_proj.astype(k.dtype), k, (((1,), (1,)), ((), ())),
                            preferred_element_type=jnp.float32)            # (TQ, Lk_pad)

    # Padded key columns: single broadcast-add of the precomputed 0 / -1e30 row.
    if needs_mask:
        s = s + mask_ref[...]

    # Numerically-stable softmax. Exact reciprocal (only TQ scalars) so attn rows
    # sum to 1 at f32 precision (approx EUP reciprocal caused the accuracy failure).
    m = jnp.max(s, axis=-1, keepdims=True)
    e = jnp.exp(s - m)
    denom = jnp.sum(e, axis=-1, keepdims=True)
    p = e * (1.0 / denom)                                                   # (TQ, Lk_pad)

    # Cast p to v's dtype so bf16 inputs hit the bf16 MXU path (no-op for f32).
    out_ref[...] = jnp.dot(p.astype(v.dtype), v,
                           preferred_element_type=jnp.float32).astype(out_ref.dtype)
    if attn_refs:
        attn_refs[0][...] = p.astype(attn_refs[0].dtype)


def dot_product_attention(q, k, v, wq, bq, *, return_attn=True,
                          tq_target=None, vmem_budget_bytes=None):
    """mapping_on='query' DotProductAttention (3-D batched branch).

    q: (B, Lq, d_query), k: (B, Lk, d_key), v: (B, Lk, d_value)
    wq: (d_key, d_query) (PyTorch Linear layout), bq: (d_key,)
    """
    B, Lq, d_query = q.shape
    _, Lk, d_key = k.shape
    d_value = v.shape[-1]
    itemsize = jnp.dtype(q.dtype).itemsize

    # Lane-dense padding: key axis (attn lane dim) and both feature dims to 128.
    Lk_pad = _round_up(Lk, 128)
    dk_pad = _round_up(d_key, 128)
    dv_pad = _round_up(d_value, 128)

    # ---- per-generation VMEM budgets -------------------------------------------
    try:
        vmem_cap = int(pltpu.get_tpu_info().vmem_capacity_bytes)
    except Exception:
        vmem_cap = 64 * _MIB          # assume the smallest (v7x: 64 MiB per TC)
    if vmem_budget_bytes is None:
        # ~40 MiB on v7x (64 MiB/TC), ~96 MiB on v5e/v6e (128 MiB).
        vmem_budget_bytes = max(16 * _MIB, min(vmem_cap - 24 * _MIB, vmem_cap * 3 // 4))
    if tq_target is None:
        tq_target = 512 if vmem_cap >= 128 * _MIB else 256

    # ---- per-step VMEM footprint, incl. live f32 softmax intermediates ----------
    def step_bytes(tq):
        streaming = tq * d_query + tq * dv_pad + (tq * Lk_pad if return_attn else 0)
        resident = (Lk_pad * dk_pad + Lk_pad * dv_pad            # k, v
                    + d_query * dk_pad + dk_pad + Lk_pad)        # wqt, bq, mask
        dma = 2 * (streaming + resident) * itemsize              # pipeline double-buffers
        scratch = (3 * tq * Lk_pad + tq * dk_pad) * 4            # s, e, p, q_proj (f32)
        return dma + scratch

    # Pick TQ: as large as possible (<= tq_target, multiple of 8) under the budget.
    lq8 = _round_up(Lq, 8)
    if lq8 <= tq_target and step_bytes(lq8) <= vmem_budget_bytes:
        TQ = lq8
    else:
        TQ = tq_target
        while TQ > 8 and (TQ > lq8 or step_bytes(TQ) > vmem_budget_bytes):
            TQ //= 2
        TQ = max(TQ, 8)
    Lq_pad = _round_up(Lq, TQ)

    # ---- zero-pad (exact: padded columns/rows are masked or sliced off) ---------
    if Lq_pad != Lq:
        q = jnp.pad(q, ((0, 0), (0, Lq_pad - Lq), (0, 0)))
    if (Lk_pad, dk_pad) != (Lk, d_key):
        k = jnp.pad(k, ((0, 0), (0, Lk_pad - Lk), (0, dk_pad - d_key)))
    if (Lk_pad, dv_pad) != (Lk, d_value):
        v = jnp.pad(v, ((0, 0), (0, Lk_pad - Lk), (0, dv_pad - d_value)))

    wqt = wq.T                                  # (d_query, d_key): transpose once.
    bq2 = bq.reshape(1, d_key)
    if dk_pad != d_key:
        wqt = jnp.pad(wqt, ((0, 0), (0, dk_pad - d_key)))
        bq2 = jnp.pad(bq2, ((0, 0), (0, dk_pad - d_key)))

    needs_mask = Lk_pad != Lk
    mask = jnp.where(jnp.arange(Lk_pad) < Lk, 0.0, -1e30).astype(jnp.float32)
    mask = mask.reshape(1, Lk_pad)

    # ---- grid / specs ------------------------------------------------------------
    grid = (B, Lq_pad // TQ)
    in_specs = [
        pl.BlockSpec((None, TQ, d_query), lambda b, i: (b, i, 0)),
        pl.BlockSpec((None, Lk_pad, dk_pad), lambda b, i: (b, 0, 0)),
        pl.BlockSpec((None, Lk_pad, dv_pad), lambda b, i: (b, 0, 0)),
        pl.BlockSpec((d_query, dk_pad), lambda b, i: (0, 0)),
        pl.BlockSpec((1, dk_pad), lambda b, i: (0, 0)),
        pl.BlockSpec((1, Lk_pad), lambda b, i: (0, 0)),
    ]
    out_shape = [jax.ShapeDtypeStruct((B, Lq_pad, dv_pad), q.dtype)]
    out_specs = [pl.BlockSpec((None, TQ, dv_pad), lambda b, i: (b, i, 0))]
    if return_attn:
        out_shape.append(jax.ShapeDtypeStruct((B, Lq_pad, Lk_pad), q.dtype))
        out_specs.append(pl.BlockSpec((None, TQ, Lk_pad), lambda b, i: (b, i, 0)))

    # Scoped VMEM limit: actual footprint + 25% headroom, capped per generation
    # (~52 MiB on v7x, ~104 MiB on v5e/v6e).
    cap = max(32 * _MIB, min(vmem_cap - 12 * _MIB, vmem_cap * 13 // 16))
    vmem_limit = int(min(max(step_bytes(TQ) * 5 // 4, 32 * _MIB), cap))

    kernel = functools.partial(_attn_kernel, needs_mask=needs_mask)
    results = pl.pallas_call(
        kernel,
        out_shape=tuple(out_shape),
        grid=grid,
        in_specs=in_specs,
        out_specs=tuple(out_specs),
        compiler_params=pltpu.CompilerParams(
            dimension_semantics=("parallel", "parallel"),
            vmem_limit_bytes=vmem_limit),
    )(q, k, v, wqt, bq2, mask)

    # Strip sequence / feature padding before returning (module semantics preserved).
    out = results[0][:, :Lq, :d_value]
    attn = results[1][:, :Lq, :Lk] if return_attn else None
    return out, attn


def _reference(q, k, v, wq, bq):
    qp = jnp.einsum("blq,kq->blk", q, wq) + bq
    s = jnp.einsum("blk,bmk->blm", qp, k)
    p = jax.nn.softmax(s, axis=-1)
    return jnp.einsum("blm,bmv->blv", p, v), p


if __name__ == "__main__":
    key = jax.random.PRNGKey(0)
    B, Lq, Lk = 2, 8, 8
    d_query, d_key, d_value = 32, 16, 16

    k1, k2, k3, k4, k5 = jax.random.split(key, 5)
    q = jax.random.normal(k1, (B, Lq, d_query), dtype=jnp.float32)
    k_in = jax.random.normal(k2, (B, Lk, d_key), dtype=jnp.float32)
    v = jax.random.normal(k3, (B, Lk, d_value), dtype=jnp.float32)
    # Deterministic Linear(d_query, d_key) params (PyTorch layout: W is (d_key, d_query)).
    wq = jax.random.normal(k4, (d_key, d_query), dtype=jnp.float32) * 0.1
    bq = jax.random.normal(k5, (d_key,), dtype=jnp.float32) * 0.1

    out, attn = dot_product_attention(q, k_in, v, wq, bq)
    out = jax.block_until_ready(out)
    attn = jax.block_until_ready(attn)

    ref_out, ref_attn = _reference(q, k_in, v, wq, bq)
    assert jnp.allclose(out, ref_out, atol=1e-3, rtol=1e-3), \
        float(jnp.max(jnp.abs(out - ref_out)))
    assert jnp.allclose(attn, ref_attn, atol=1e-3, rtol=1e-3), \
        float(jnp.max(jnp.abs(attn - ref_attn)))

    print("KERNEL_OK")
</pallas_src>

<mosaic_0001>
module attributes {stable_mosaic.version = 11 : i64} {
  func.func @_attn_kernel(%arg0: i32, %arg1: i32, %arg2: memref<1x8x32xf32, #tpu.memory_space<vmem>>, %arg3: memref<1x128x128xf32, #tpu.memory_space<vmem>>, %arg4: memref<1x128x128xf32, #tpu.memory_space<vmem>>, %arg5: memref<32x128xf32, #tpu.memory_space<vmem>>, %arg6: memref<1x128xf32, #tpu.memory_space<vmem>>, %arg7: memref<1x128xf32, #tpu.memory_space<vmem>>, %arg8: memref<1x8x128xf32, #tpu.memory_space<vmem>>, %arg9: memref<1x8x128xf32, #tpu.memory_space<vmem>>) attributes {dimension_semantics = [#tpu.dimension_semantics<parallel>, #tpu.dimension_semantics<parallel>], iteration_bounds = array<i64: 2, 1>, scalar_prefetch = 0 : i64, scratch_operands = 0 : i64, tpu.core_type = #tpu.core_type<tc>, window_params = [{transform_indices = @transform_0, window_bounds = array<i64: 1, 8, 32>}, {transform_indices = @transform_1, window_bounds = array<i64: 1, 128, 128>}, {transform_indices = @transform_2, window_bounds = array<i64: 1, 128, 128>}, {pipeline_mode = #tpu.pipeline_mode<synchronous>, transform_indices = @transform_3, window_bounds = array<i64: 32, 128>}, {pipeline_mode = #tpu.pipeline_mode<synchronous>, transform_indices = @transform_4, window_bounds = array<i64: 1, 128>}, {pipeline_mode = #tpu.pipeline_mode<synchronous>, transform_indices = @transform_5, window_bounds = array<i64: 1, 128>}, {transform_indices = @transform_6, window_bounds = array<i64: 1, 8, 128>}, {transform_indices = @transform_7, window_bounds = array<i64: 1, 8, 128>}]} {
    %c0 = arith.constant 0 : index
    %c0_0 = arith.constant 0 : index
    %c0_1 = arith.constant 0 : index
    %0 = vector.load %arg2[%c0, %c0_0, %c0_1] : memref<1x8x32xf32, #tpu.memory_space<vmem>>, vector<1x8x32xf32>
    %1 = vector.shape_cast %0 : vector<1x8x32xf32> to vector<8x32xf32>
    %c0_2 = arith.constant 0 : index
    %c0_3 = arith.constant 0 : index
    %c0_4 = arith.constant 0 : index
    %2 = vector.load %arg3[%c0_2, %c0_3, %c0_4] : memref<1x128x128xf32, #tpu.memory_space<vmem>>, vector<1x128x128xf32>
    %3 = vector.shape_cast %2 : vector<1x128x128xf32> to vector<128x128xf32>
    %c0_5 = arith.constant 0 : index
    %c0_6 = arith.constant 0 : index
    %c0_7 = arith.constant 0 : index
    %4 = vector.load %arg4[%c0_5, %c0_6, %c0_7] : memref<1x128x128xf32, #tpu.memory_space<vmem>>, vector<1x128x128xf32>
    %5 = vector.shape_cast %4 : vector<1x128x128xf32> to vector<128x128xf32>
    %c0_8 = arith.constant 0 : index
    %c0_9 = arith.constant 0 : index
    %6 = vector.load %arg5[%c0_8, %c0_9] : memref<32x128xf32, #tpu.memory_space<vmem>>, vector<32x128xf32>
    %c0_10 = arith.constant 0 : index
    %c0_11 = arith.constant 0 : index
    %7 = vector.load %arg6[%c0_10, %c0_11] : memref<1x128xf32, #tpu.memory_space<vmem>>, vector<1x128xf32>
    %cst = arith.constant dense<0.000000e+00> : vector<8x128xf32>
    %8 = tpu.matmul %1, %6, %cst {dimension_numbers = #tpu.dot_dimension_numbers<[1], [0], [0], [1], [0, 0, 1, 1], [], []>} : vector<8x32xf32>, vector<32x128xf32>, vector<8x128xf32> -> vector<8x128xf32>
    %9 = vector.broadcast %7 : vector<1x128xf32> to vector<8x128xf32>
    %10 = arith.addf %8, %9 : vector<8x128xf32>
    %cst_12 = arith.constant dense<0.000000e+00> : vector<8x128xf32>
    %11 = tpu.matmul %10, %3, %cst_12 {dimension_numbers = #tpu.dot_dimension_numbers<[1], [1], [0], [0], [0, 0, 1, 0], [], []>} : vector<8x128xf32>, vector<128x128xf32>, vector<8x128xf32> -> vector<8x128xf32>
    %c0_13 = arith.constant 0 : index
    %c0_14 = arith.constant 0 : index
    %12 = vector.load %arg7[%c0_13, %c0_14] : memref<1x128xf32, #tpu.memory_space<vmem>>, vector<1x128xf32>
    %13 = vector.broadcast %12 : vector<1x128xf32> to vector<8x128xf32>
    %14 = arith.addf %11, %13 : vector<8x128xf32>
    %cst_15 = arith.constant dense<0xFF800000> : vector<8xf32>
    %15 = vector.multi_reduction <maximumf>, %14, %cst_15 [1] : vector<8x128xf32> to vector<8xf32>
    %16 = vector.shape_cast %15 : vector<8xf32> to vector<8x1xf32>
    %17 = vector.broadcast %16 : vector<8x1xf32> to vector<8x128xf32>
    %18 = arith.subf %14, %17 : vector<8x128xf32>
    %19 = math.exp %18 : vector<8x128xf32>
    %cst_16 = arith.constant dense<0.000000e+00> : vector<8xf32>
    %20 = vector.multi_reduction <add>, %19, %cst_16 [1] : vector<8x128xf32> to vector<8xf32>
    %21 = vector.shape_cast %20 : vector<8xf32> to vector<8x1xf32>
    %cst_17 = arith.constant 1.000000e+00 : f32
    %22 = vector.broadcast %cst_17 : f32 to vector<8x1xf32>
    %23 = arith.divf %22, %21 : vector<8x1xf32>
    %24 = vector.broadcast %23 : vector<8x1xf32> to vector<8x128xf32>
    %25 = arith.mulf %19, %24 : vector<8x128xf32>
    %cst_18 = arith.constant dense<0.000000e+00> : vector<8x128xf32>
    %26 = tpu.matmul %25, %5, %cst_18 {dimension_numbers = #tpu.dot_dimension_numbers<[1], [0], [0], [1], [0, 0, 1, 1], [], []>} : vector<8x128xf32>, vector<128x128xf32>, vector<8x128xf32> -> vector<8x128xf32>
    %c0_19 = arith.constant 0 : index
    %c0_20 = arith.constant 0 : index
    %c0_21 = arith.constant 0 : index
    %27 = vector.load %arg8[%c0_19, %c0_20, %c0_21] : memref<1x8x128xf32, #tpu.memory_space<vmem>>, vector<1x8x128xf32>
    %28 = vector.shape_cast %27 : vector<1x8x128xf32> to vector<8x128xf32>
    %29 = vector.shape_cast %26 : vector<8x128xf32> to vector<1x8x128xf32>
    tpu.vector_store %arg8[%c0_19, %c0_20, %c0_21], %29 {strides = array<i32>} : memref<1x8x128xf32, #tpu.memory_space<vmem>>, vector<1x8x128xf32>,
    %c0_22 = arith.constant 0 : index
    %c0_23 = arith.constant 0 : index
    %c0_24 = arith.constant 0 : index
    %30 = vector.load %arg9[%c0_22, %c0_23, %c0_24] : memref<1x8x128xf32, #tpu.memory_space<vmem>>, vector<1x8x128xf32>
    %31 = vector.shape_cast %30 : vector<1x8x128xf32> to vector<8x128xf32>
    %32 = vector.shape_cast %25 : vector<8x128xf32> to vector<1x8x128xf32>
    tpu.vector_store %arg9[%c0_22, %c0_23, %c0_24], %32 {strides = array<i32>} : memref<1x8x128xf32, #tpu.memory_space<vmem>>, vector<1x8x128xf32>,
    return
  }
  func.func @transform_0(%arg0: i32, %arg1: i32) -> (i32, i32, i32) {
    %c0_i32 = arith.constant 0 : i32
    %c0_i32_0 = arith.constant 0 : i32
    return %arg0, %arg1, %c0_i32 : i32, i32, i32
  }
  func.func @transform_1(%arg0: i32, %arg1: i32) -> (i32, i32, i32) {
    %c0_i32 = arith.constant 0 : i32
    %c0_i32_0 = arith.constant 0 : i32
    %c0_i32_1 = arith.constant 0 : i32
    return %arg0, %c0_i32, %c0_i32_0 : i32, i32, i32
  }
  func.func @transform_2(%arg0: i32, %arg1: i32) -> (i32, i32, i32) {
    %c0_i32 = arith.constant 0 : i32
    %c0_i32_0 = arith.constant 0 : i32
    %c0_i32_1 = arith.constant 0 : i32
    return %arg0, %c0_i32, %c0_i32_0 : i32, i32, i32
  }
  func.func @transform_3(%arg0: i32, %arg1: i32) -> (i32, i32) {
    %c0_i32 = arith.constant 0 : i32
    %c0_i32_0 = arith.constant 0 : i32
    %c0_i32_1 = arith.constant 0 : i32
    return %c0_i32, %c0_i32_0 : i32, i32
  }
  func.func @transform_4(%arg0: i32, %arg1: i32) -> (i32, i32) {
    %c0_i32 = arith.constant 0 : i32
    %c0_i32_0 = arith.constant 0 : i32
    %c0_i32_1 = arith.constant 0 : i32
    return %c0_i32, %c0_i32_0 : i32, i32
  }
  func.func @transform_5(%arg0: i32, %arg1: i32) -> (i32, i32) {
    %c0_i32 = arith.constant 0 : i32
    %c0_i32_0 = arith.constant 0 : i32
    %c0_i32_1 = arith.constant 0 : i32
    return %c0_i32, %c0_i32_0 : i32, i32
  }
  func.func @transform_6(%arg0: i32, %arg1: i32) -> (i32, i32, i32) {
    %c0_i32 = arith.constant 0 : i32
    %c0_i32_0 = arith.constant 0 : i32
    return %arg0, %arg1, %c0_i32 : i32, i32, i32
  }
  func.func @transform_7(%arg0: i32, %arg1: i32) -> (i32, i32, i32) {
    %c0_i32 = arith.constant 0 : i32
    %c0_i32_0 = arith.constant 0 : i32
    return %arg0, %arg1, %c0_i32 : i32, i32, i32
  }
}

</mosaic_0001>

<bundles_post_ra>
// kernel: tpu_custom_call.1
= control target key start
LH: loop header
LB: loop body
LE: loop exit
PB: predicated region body
PF: predicated region fallthrough
CT: control target
= control target key end

     0   :  { %s1761_s0 = inlined_call_operand.hbm [shape: f32[2,8,32], index: 0, kind: input, shape index: {}]   ;;  %s1762_s1 = inlined_call_operand.hbm [shape: f32[2,128,128], index: 1, kind: input, shape index: {}]   ;;  %s1763_s2 = inlined_call_operand.hbm [shape: f32[2,128,128], index: 2, kind: input, shape index: {}]   ;;  %s1764_s3 = inlined_call_operand.hbm [shape: f32[32,128], index: 3, kind: input, shape index: {}]   ;;  %s1765_s4 = inlined_call_operand.vmem [shape: f32[1,128], index: 4, kind: input, shape index: {}]   ;;  %s1766_s5 = inlined_call_operand.vmem [shape: f32[1,128], index: 5, kind: input, shape index: {}]   ;;  %s1767_s6 = inlined_call_operand.hbm [shape: f32[2,8,128], index: 6, kind: output, shape index: {0}]   ;;  %s1768_s7 = inlined_call_operand.hbm [shape: f32[2,8,128], index: 7, kind: output, shape index: {1}]  }
   0x1   :  { %1778 = sst [smem:[#allocation22_spill]] %s1761_s0 }
   0x2   :  { %1779 = sst [smem:[#allocation23_spill]] %s1762_s1 }
   0x3   :  { %1780 = sst [smem:[#allocation24_spill]] %s1763_s2 }
   0x4   :  { %13 = vsyncpa [#allocation3], 0 }
   0x5   :  { %15 = vsyncpa [#allocation3 + $0x1], 0 }
   0x6   :  { %16 = vsyncpa [#allocation6], 0 }
   0x7   :  { %18 = vsyncpa [#allocation6 + $0x1], 0 }
   0x8   :  { %19 = vsyncpa [#allocation9], 0 }
   0x9   :  { %20 = vsyncpa [#allocation4], 0 }
   0xa   :  { %22 = vsyncpa [#allocation4 + $0x1], 0 }
   0xb   :  { %23 = vsyncpa [#allocation12], 0 }
   0xc   :  { %25 = vsyncpa [#allocation12 + $0x1], 0  ;;  %s1420_s24 = smov 0   ;;  %s1422_s25 = smov 0  }
   0xd   :  { %s1424_s26 = smov 0   ;;  %s1426_s27 = smov 0  }
   0xe   :  { %s1428_s28 = smov 0   ;;  %s1430_s29 = smov 0  }
   0xf LB: > { %1781 = sst [smem:[#allocation18_spill]] %s1356_s26  ;;  %s43_s30 = sadd.s32 1, %s1364_s28  ;;  %s1368_s29 = sphi %s1430_s29, %s31_s29   ;;  %s1364_s28 = sphi %s1428_s28, %s1804_s28   ;;  %s1360_s27 = sphi %s1426_s27, %s1803_s27   ;;  %s1356_s26 = sphi %s1424_s26, %s1802_s26   ;;  %s1352_s25 = sphi %s1422_s25, %s1806_s25   ;;  %s1348_s24 = sphi %s1420_s24, %s1805_s24  }
  0x10   : > { %1782 = sst [smem:[#allocation19_spill]] %s1364_s28  ;;  %s52_s8 = sadd.s32 1, %s1356_s26 }
  0x11   : > { %p45_p0 = scmp.ge.s32.totalorder %s43_s30, 2  ;;  %p59_p1 = scmp.ne.s32.totalorder %s1356_s26, %s1352_s25 }
  0x12   : > { %p60_p2 = scmp.eq.s32.totalorder %s1368_s29, 0  ;;  %p1080_p6 = scmp.lt.s32.totalorder %s1368_s29, 2 }
  0x13   : > { %s1808_s30 = smov (%p45_p0, %s43_s30), 0  ;;  %s1465_s10 = sand.u32 1, %s1356_s26  }
  0x14   : > { %1783 = sst [smem:[#allocation20_spill]] %s1808_s30  ;;  %p61_p3 = por %p60_p2, %p59_p1 }
  0x15   : > { %s47_s9 = ssub.s32 %s1364_s28, %s1808_s30  ;;  %s298_s11 = sand.u32 1, %s1368_s29  }
  0x16   : > { %p50_p5 = scmp.eq.s32.totalorder %s47_s9, 0  ;;  %p1471_p7 = pnand %p1080_p6, %p61_p3 }
  0x17   : > { %s900_s14 = sshll.u32 %s1465_s10, 7  ;;  %s922_s15 = sshll.u32 %s1364_s28, 11 }
  0x18   : > { %s1469_s12 = scalar_select %p50_p5, %s1356_s26, %s52_s8  }
  0x19   : > { %s1786_s1 = sld [smem:[#allocation23_spill]]  ;;  %s302_s19 = scalar_lea.vmem [#allocation5], %s900_s14 }
  0x1a   : > { %1784 = sst [smem:[#allocation21_spill]] %s1469_s12  ;;  %s309_s20 = sshll.u32 %s302_s19, 4  ;;  %s310_s20 = int_to_ptr.vmem [resolvable:$true] %s309_s20 }
  0x1b   : > { %s1480_s21 = scalar_lea.sflag [#allocation6], %s298_s11  ;;  %p1776_p8 = pneg %p1471_p7 }
  0x1c   : > { %s1153_s22 = scalar_lea.vmem %s310_s20, 2048  ;;  %s1370_s23 = smov [#allocation5]  }
  0x1d   : > { %p1154_p9 = scmp.ne.s32.totalorder %s310_s20, %s1153_s22  ;;  %s1158_s8 = sshll.u32 %s1370_s23, 4  ;;  %s1159_s8 = int_to_ptr.vmem [resolvable:$false] %s1158_s8 }
  0x1e   : > { %s1160_s9 = scalar_lea.vmem %s1159_s8, 4096  ;;  %p1161_p12 = scmp.lt.s32.totalorder %s310_s20, %s1159_s8 }
  0x1f   : > { %s308_s18 = scalar_lea.hbm %s1786_s1, %s922_s15  ;;  %p1156_p10 = pnand %p1154_p9, %p1776_p8 }
  0x20   : > { %p1162_p13 = scmp.lt.s32.totalorder %s1160_s9, %s1153_s22 }
  0x21   : > { %p1157_p11 = pneg %p1156_p10 }
  0x22   : > { %p1163_p0 = por %p1162_p13, %p1161_p12 }
  0x24   : > { %p1164_p2 = pnand %p1163_p0, %p1157_p11 }
  0x26   : > { %1167 = shalt.err (!%p1164_p2)
}
  0x27   : > { %s1769_s16 = smov 128   ;;  %s1771_s11 = smov 8  }
  0x28   : > { %1068 = dma.hbm_to_vmem [thread:$0]  (!%p1471_p7), %s308_s18, 2048, %s310_s20, %s1480_s21, %s1769_s16, %s1769_s16, %s1771_s11  }
  0x29   : > { %s1787_s2 = sld [smem:[#allocation24_spill]]  ;;  %s323_s23 = scalar_lea.vmem [#allocation7], %s900_s14 }
  0x2a   : > { %s330_s8 = sshll.u32 %s323_s23, 4  ;;  %s1499_s9 = sadd.s32 4294967295, %s1368_s29   ;;  %s1529_s8 = int_to_ptr.vmem [resolvable:$true] %s330_s8 }
  0x2b   : > { %s894_s1 = sadd.s32 4294967294, %s1368_s29   ;;  %p65_p3 = scmp.ne.s32.totalorder %s1352_s25, %s1348_s24 }
  0x2c   : > { %p1775_p5 = scmp.eq.s32.totalorder %s1499_s9, 0  ;;  %p206_p6 = scmp.eq.s32.totalorder %s1499_s9, 1 }
  0x2d   : > { %p212_p9 = scmp.eq.s32.totalorder %s894_s1, 1  ;;  %p895_p10 = scmp.ge.s32.totalorder %s1368_s29, 1 }
  0x2e   : > { %p1509_p11 = por %p1775_p5, %p65_p3  ;;  %p1516_p12 = por %p206_p6, %p59_p1 }
  0x2f   : > { %s1496_s22 = scalar_lea.hbm %s1787_s2, %s922_s15  ;;  %p1520_p13 = por %p212_p9, %p65_p3 }
  0x30   : > { %p247_p0 = scmp.lt.s32.totalorder %s1368_s29, 3  ;;  %s1373_s1 = smov [#allocation8]  }
  0x31   : > { %s259_s17 = sshll.u32 %s1373_s1, 4  ;;  %s898_s19 = sshll.u32 %s1465_s10, 3  ;;  %s260_s17 = int_to_ptr.vmem [resolvable:$true] %s259_s17 }
  0x32   : > { %p1525_p2 = pnand %p895_p10, %p247_p0  ;;  %s899_s23 = sshll.u32 %s1364_s28, 7 }
  0x33   : > { %s1793_s0 = sld [smem:[#allocation22_spill]]  ;;  %s283_s12 = scalar_lea.vmem [#allocation2], %s898_s19 }
  0x34   : > { %p1058_p1 = pneg %p1525_p2  ;;  %s291_s1 = sshll.u32 %s283_s12, 4  ;;  %s292_s1 = int_to_ptr.vmem [resolvable:$true] %s291_s1 }
  0x35   : > { %s1179_s26 = scalar_lea.vmem %s260_s17, 512  ;;  %p1187_p4 = scmp.lt.s32.totalorder %s260_s17, %s260_s17 }
  0x36   : > { %p1537_p3 = pnand %p1058_p1, %p1775_p5  ;;  %p1180_p9 = scmp.ne.s32.totalorder %s260_s17, %s1179_s26 }
  0x37   : > { %p1188_p1 = scmp.lt.s32.totalorder %s1179_s26, %s1179_s26 }
  0x38   : > { %p1170_p6 = pneg %p1537_p3 }
  0x39   : > { %s1544_s30 = scalar_lea.hbm %s1793_s0, %s899_s23  ;;  %p1189_p5 = por %p1188_p1, %p1187_p4 }
  0x3a   : > { %p1182_p10 = pnand %p1180_p9, %p1170_p6 }
  0x3c   : > { %p1183_p0 = pneg %p1182_p10 }
  0x3e   : > { %p1190_p8 = pnand %p1189_p5, %p1183_p0 }
  0x40   : > { %1193 = shalt.err (!%p1190_p8)
}
  0x41   : > { %s1794_s2 = smov 8   ;;  %s1795_s11 = smov 128  }
  0x42   : > { %1061 = dma.hbm_to_vmem [thread:$0]  (!%p1537_p3), %s1764_s3, 512, %s260_s17, [#allocation9], %s1795_s11, %s1795_s11, %s1794_s2  }
  0x43   : > { %s280_s12 = scalar_lea.sflag [#allocation3], %s1465_s10  ;;  %s1207_s0 = scalar_lea.vmem %s292_s1, 128 }
  0x44   : > { %p1208_p6 = scmp.ne.s32.totalorder %s292_s1, %s1207_s0  ;;  %p1796_p9 = pneg %p1471_p7 }
  0x45   : > { %s1374_s26 = smov [#allocation2]  }
  0x46   : > { %p1210_p10 = pnand %p1208_p6, %p1796_p9  ;;  %s1212_s28 = sshll.u32 %s1374_s26, 4  ;;  %s1213_s28 = int_to_ptr.vmem [resolvable:$false] %s1212_s28 }
  0x47   : > { %s1214_s16 = scalar_lea.vmem %s1213_s28, 256  ;;  %p1215_p8 = scmp.lt.s32.totalorder %s292_s1, %s1213_s28 }
  0x48   : > { %p1211_p4 = pneg %p1210_p10  ;;  %p1216_p5 = scmp.lt.s32.totalorder %s1214_s16, %s1207_s0 }
  0x4a   : > { %p1217_p0 = por %p1216_p5, %p1215_p8 }
  0x4c   : > { %p1218_p1 = pnand %p1217_p0, %p1211_p4 }
  0x4e   : > { %1221 = shalt.err (!%p1218_p1)
}
  0x4f   : > { %1065 = dma.hbm_to_vmem [thread:$0]  (!%p1471_p7), %s1544_s30, 128, %s292_s1, %s280_s12  }
  0x50   : > { %s1235_s10 = scalar_lea.vmem %s1529_s8, 2048  ;;  %p1797_p6 = pmov %p1796_p9 }
  0x51   : > { %p1236_p3 = scmp.ne.s32.totalorder %s1529_s8, %s1235_s10  ;;  %s1375_s17 = smov [#allocation7]  }
  0x52   : > { %s1240_s28 = sshll.u32 %s1375_s17, 4  ;;  %s1241_s28 = int_to_ptr.vmem [resolvable:$false] %s1240_s28 }
  0x53   : > { %p1238_p9 = pnand %p1236_p3, %p1797_p6  ;;  %s1242_s0 = scalar_lea.vmem %s1241_s28, 4096 }
  0x54   : > { %p1243_p4 = scmp.lt.s32.totalorder %s1529_s8, %s1241_s28  ;;  %p1244_p8 = scmp.lt.s32.totalorder %s1242_s0, %s1235_s10 }
  0x55   : > { %p1239_p10 = pneg %p1238_p9 }
  0x56   : > { %p1245_p5 = por %p1244_p8, %p1243_p4 }
  0x58   : > { %p1246_p0 = pnand %p1245_p5, %p1239_p10 }
  0x5a   : > { %1249 = shalt.err (!%p1246_p0)
}
  0x5b   : > { %1071 = dma.hbm_to_vmem [thread:$0]  (!%p1471_p7), %s1496_s22, 2048, %s1529_s8, %s1480_s21, %s1795_s11, %s1795_s11, %s1794_s2  }
  0x5c   : > { %342 = sbr.rel (%p1525_p2) target bundleno = 1021 (0x3fd), region = 44  ;;  %s1580_s30 = sand.u32 (!%p1525_p2), 1, %s1352_s25  }
  0x5d   : > { %s1583_s1 = sshll.u32 (!%p1525_p2), %s1580_s30, 3  ;;  %s345_s13 = scalar_lea.sflag (!%p1525_p2), [#allocation3], %s1580_s30 }
  0x5e   : > { %s348_s23 = scalar_lea.vmem (!%p1525_p2), [#allocation2], %s1583_s1 }
  0x61   : > { %1327 = dma.done.wait (%p1509_p11), %s345_s13, 128  }
  0x62   : > { %1329 = vsyncadd (%p1509_p11), %s345_s13, 4294967168  ;;  %s353_s21 = sand.u32 1, %s1499_s9   ;;  %s908_s22 = sshll.u32 %s1580_s30, 7 }
  0x63   : > { %s354_s8 = scalar_lea.sflag [#allocation6], %s353_s21  ;;  %s1593_s20 = scalar_lea.vmem [#allocation5], %s908_s22 }
  0x64   : > { %1331 = dma.done.wait (%p1509_p11), %s354_s8, 4096  }
  0x65   : > { %1333 = vsyncadd (%p1509_p11), %s354_s8, 4294963200  ;;  %s1599_s2 = scalar_lea.vmem [#allocation7], %s908_s22  ;;  %p1798_p7 = scmp.eq.s32.totalorder %s1499_s9, 0 }
  0x67   : > { %1335 = dma.done.wait (%p1798_p7), [#allocation9], 512   ;;  %p1799_p2 = pmov %p1798_p7 }
  0x68   : > { %v1376_v0 = vmov 0.0   ;;  %vm1377_vm0 = vmmov 0   ;;  %v452_v1 = vld [vmem:[#allocation8 + $0x18] sm:$0xff]  ;;  %v451_v2 = vld [vmem:[#allocation8 + $0x10] sm:$0xff]  ;;  %v450_v4 = vld [vmem:[#allocation8 + $0x8] sm:$0xff]  ;;  %vm460_vm1 = vcmask 261120  }
  0x69   : > { %1337 = vsyncadd (%p1799_p2), [#allocation9], 4294966784  ;;  %963 = vmatprep.subr.mxu0 %v1376_v0  ;;  %971 = vmatprep.mubr.msk.f32.mxu0 %vm1377_vm0, %v1376_v0  ;;  %v432_v3 = vld [vmem:[%s1593_s20 + $0x78] sm:$0xff]  ;;  %v431_v5 = vld [vmem:[%s1593_s20 + $0x70] sm:$0xff]  ;;  %s415_s12 = scalar_lea.vmem [#allocation11], %s1583_s1  ;;  %s918_s26 = sshll.u32 %s1360_s27, 7 }
  0x6a   : > { %974 = vmatprep.subr.mxu1 %v1376_v0  ;;  %1006 = vmatprep.mubr.msk.f32.mxu1 %vm1377_vm0, %v1376_v0  ;;  %v449_v6 = vld [vmem:[#allocation8] sm:$0xff]  ;;  %v416_v7 = vld [vmem:[%s348_s23] sm:$0xff]  ;;  %v430_v8 = vld [vmem:[%s1593_s20 + $0x68] sm:$0xff]  ;;  %s725_s17 = scalar_lea.hbm %s1768_s7, %s918_s26  ;;  %s727_s28 = sshll.u32 %s415_s12, 4  ;;  %s728_s28 = int_to_ptr.vmem [resolvable:$true] %s727_s28 }
  0x6b   : > { %964 = vmatpush3.msra.mxu0 %v452_v1  ;;  %975 = vmatpush3.xpose.msra.mxu1 %v432_v3  ;;  %v429_v9 = vld [vmem:[%s1593_s20 + $0x60] sm:$0xff]  ;;  %v428_v10 = vld [vmem:[%s1593_s20 + $0x58] sm:$0xff]  ;;  %v427_v11 = vld [vmem:[%s1593_s20 + $0x50] sm:$0xff]  ;;  %s699_s0 = scalar_lea.sflag [#allocation12], %s1580_s30  ;;  %s1250_s13 = scalar_lea.vmem %s728_s28, 128 }
  0x6c   : > { %965 = vmatprep.subr.mxu0 %v1376_v0  ;;  %976 = vmatprep.subr.mxu1 %v1376_v0  ;;  %v426_v12 = vld [vmem:[%s1593_s20 + $0x48] sm:$0xff]  ;;  %v425_v13 = vld [vmem:[%s1593_s20 + $0x40] sm:$0xff]  ;;  %v424_v14 = vld [vmem:[%s1593_s20 + $0x38] sm:$0xff]  ;;  %p1251_p11 = scmp.ne.s32.totalorder %s728_s28, %s1250_s13  ;;  %s1378_s23 = smov [#allocation11]  }
  0x6d   : > { %966 = vmatpush3.msra.mxu0 %v451_v2  ;;  %v423_v15 = vld [vmem:[%s1593_s20 + $0x30] sm:$0xff]  ;;  %v422_v16 = vld [vmem:[%s1593_s20 + $0x28] sm:$0xff]  ;;  %v421_v17 = vld [vmem:[%s1593_s20 + $0x20] sm:$0xff]  ;;  %s1254_s21 = sshll.u32 %s1378_s23, 4  ;;  %s1255_s21 = int_to_ptr.vmem [resolvable:$false] %s1254_s21 }
  0x6e   : > { %967 = vmatprep.subr.mxu0 %v1376_v0  ;;  %v420_v18 = vld [vmem:[%s1593_s20 + $0x18] sm:$0xff]  ;;  %v419_v19 = vld [vmem:[%s1593_s20 + $0x10] sm:$0xff]  ;;  %v418_v20 = vld [vmem:[%s1593_s20 + $0x8] sm:$0xff]  ;;  %p1252_p1 = pnand %p1251_p11, %p1516_p12  ;;  %s1256_s22 = scalar_lea.vmem %s1255_s21, 256 }
  0x6f   : > { %968 = vmatpush3.msra.mxu0 %v450_v4  ;;  %977 = vmatpush3.xpose.msra.mxu1 %v431_v5  ;;  %v417_v21 = vld [vmem:[%s1593_s20] sm:$0xff]  ;;  %v913_v22 = vld [vmem:[%s1765_s4] ss:$0 sm:$0xff]  ;;  %v448_v30 = vld [vmem:[%s1599_s2 + $0x78] sm:$0xff]  ;;  %p1257_p6 = scmp.lt.s32.totalorder %s728_s28, %s1255_s21  ;;  %p1258_p9 = scmp.lt.s32.totalorder %s1256_s22, %s1250_s13 }
  0x70   : > { %969 = vmatprep.subr.mxu0 %v1376_v0  ;;  %978 = vmatprep.subr.mxu1 %v1376_v0  ;;  %v915_v26 = vld [vmem:[%s1766_s5] ss:$0 sm:$0xff]  ;;  %v446_v32 = vld [vmem:[%s1599_s2 + $0x68] sm:$0xff]  ;;  %v445_v33 = vld [vmem:[%s1599_s2 + $0x60] sm:$0xff]  ;;  %p1253_p3 = pneg %p1252_p1 }
  0x71   : > { %970 = vmatpush3.msra.mxu0 %v449_v6  ;;  %v447_v31 = vld [vmem:[%s1599_s2 + $0x70] sm:$0xff]  ;;  %v444_v34 = vld [vmem:[%s1599_s2 + $0x58] sm:$0xff]  ;;  %v442_v36 = vld [vmem:[%s1599_s2 + $0x48] sm:$0xff]  ;;  %p1259_p10 = por %p1258_p9, %p1257_p6 }
  0x72   : > { %972 = vmatmul.mubr.msk.f32.vlgmr.msra.gmra.mxu0 %vm460_vm1, %v416_v7  ;;  %1009 = vmatprep.subr.mxu0 %v1376_v0  ;;  %v443_v35 = vld [vmem:[%s1599_s2 + $0x50] sm:$0xff]  ;;  %v441_v37 = vld [vmem:[%s1599_s2 + $0x40] sm:$0xff]  ;;  %v440_v42 = vld [vmem:[%s1599_s2 + $0x38] sm:$0xff] }
  0x73   : > { %1041 = vmatprep.mubr.msk.f32.mxu0 %vm1377_vm0, %v1376_v0  ;;  %979 = vmatpush3.xpose.msra.mxu1 %v430_v8  ;;  %v439_v43 = vld [vmem:[%s1599_s2 + $0x30] sm:$0xff]  ;;  %v438_v44 = vld [vmem:[%s1599_s2 + $0x28] sm:$0xff]  ;;  %v437_v45 = vld [vmem:[%s1599_s2 + $0x20] sm:$0xff]  ;;  %p1260_p4 = pnand %p1259_p10, %p1253_p3 }
  0x74   : > { %980 = vmatprep.subr.mxu1 %v1376_v0  ;;  %1010 = vmatpush3.msra.mxu0 %v448_v30  ;;  %v436_v46 = vld [vmem:[%s1599_s2 + $0x18] sm:$0xff]  ;;  %v435_v47 = vld [vmem:[%s1599_s2 + $0x10] sm:$0xff]  ;;  %v434_v48 = vld [vmem:[%s1599_s2 + $0x8] sm:$0xff] }
  0x75   : > { %1011 = vmatprep.subr.mxu0 %v1376_v0  ;;  %v433_v49 = vld [vmem:[%s1599_s2] sm:$0xff] }
  0x76   : > { %1012 = vmatpush3.msra.mxu0 %v447_v31 }
  0x77   : > { %981 = vmatpush3.xpose.msra.mxu1 %v429_v9  ;;  %1013 = vmatprep.subr.mxu0 %v1376_v0 }
  0x78   : > { %982 = vmatprep.subr.mxu1 %v1376_v0  ;;  %1014 = vmatpush3.msra.mxu0 %v446_v32 }
  0x79   : > { %1015 = vmatprep.subr.mxu0 %v1376_v0 }
  0x7a   : > { %1016 = vmatpush3.msra.mxu0 %v445_v33 }
  0x7b   : > { %983 = vmatpush3.xpose.msra.mxu1 %v428_v10  ;;  %1017 = vmatprep.subr.mxu0 %v1376_v0 }
  0x7c   : > { %984 = vmatprep.subr.mxu1 %v1376_v0  ;;  %1018 = vmatpush3.msra.mxu0 %v444_v34 }
  0x7d   : > { %1019 = vmatprep.subr.mxu0 %v1376_v0 }
  0x7e   : > { %1020 = vmatpush3.msra.mxu0 %v443_v35 }
  0x7f   : > { %985 = vmatpush3.xpose.msra.mxu1 %v427_v11  ;;  %1021 = vmatprep.subr.mxu0 %v1376_v0 }
  0x80   : > { %986 = vmatprep.subr.mxu1 %v1376_v0  ;;  %1022 = vmatpush3.msra.mxu0 %v442_v36 }
  0x81   : > { %1023 = vmatprep.subr.mxu0 %v1376_v0 }
  0x82   : > { %1024 = vmatpush3.msra.mxu0 %v441_v37 }
  0x83   : > { %987 = vmatpush3.xpose.msra.mxu1 %v426_v12  ;;  %1025 = vmatprep.subr.mxu0 %v1376_v0 }
  0x84   : > { %988 = vmatprep.subr.mxu1 %v1376_v0  ;;  %1026 = vmatpush3.msra.mxu0 %v440_v42 }
  0x85   : > { %1027 = vmatprep.subr.mxu0 %v1376_v0 }
  0x86   : > { %1028 = vmatpush3.msra.mxu0 %v439_v43 }
  0x87   : > { %989 = vmatpush3.xpose.msra.mxu1 %v425_v13  ;;  %1029 = vmatprep.subr.mxu0 %v1376_v0 }
  0x88   : > { %990 = vmatprep.subr.mxu1 %v1376_v0  ;;  %1030 = vmatpush3.msra.mxu0 %v438_v44 }
  0x89   : > { %1031 = vmatprep.subr.mxu0 %v1376_v0 }
  0x8a   : > { %1032 = vmatpush3.msra.mxu0 %v437_v45 }
  0x8b   : > { %991 = vmatpush3.xpose.msra.mxu1 %v424_v14  ;;  %1033 = vmatprep.subr.mxu0 %v1376_v0 }
  0x8c   : > { %992 = vmatprep.subr.mxu1 %v1376_v0  ;;  %1034 = vmatpush3.msra.mxu0 %v436_v46 }
  0x8d   : > { %1035 = vmatprep.subr.mxu0 %v1376_v0 }
  0x8e   : > { %1036 = vmatpush3.msra.mxu0 %v435_v47 }
  0x8f   : > { %993 = vmatpush3.xpose.msra.mxu1 %v423_v15  ;;  %1037 = vmatprep.subr.mxu0 %v1376_v0 }
  0x90   : > { %994 = vmatprep.subr.mxu1 %v1376_v0  ;;  %1038 = vmatpush3.msra.mxu0 %v434_v48 }
  0x91   : > { %1039 = vmatprep.subr.mxu0 %v1376_v0 }
  0x92   : > { %1040 = vmatpush3.msra.mxu0 %v433_v49 }
  0x93   : > { %995 = vmatpush3.xpose.msra.mxu1 %v422_v16 }
  0x94   : > { %996 = vmatprep.subr.mxu1 %v1376_v0 }
  0x97   : > { %997 = vmatpush3.xpose.msra.mxu1 %v421_v17 }
  0x98   : > { %998 = vmatprep.subr.mxu1 %v1376_v0 }
  0x9b   : > { %999 = vmatpush3.xpose.msra.mxu1 %v420_v18 }
  0x9c   : > { %1000 = vmatprep.subr.mxu1 %v1376_v0 }
  0x9f   : > { %1001 = vmatpush3.xpose.msra.mxu1 %v419_v19 }
  0xa0   : > { %1002 = vmatprep.subr.mxu1 %v1376_v0 }
  0xa3   : > { %1003 = vmatpush3.xpose.msra.mxu1 %v418_v20 }
  0xa4   : > { %1004 = vmatprep.subr.mxu1 %v1376_v0 }
  0xa7   : > { %1005 = vmatpush3.xpose.msra.mxu1 %v417_v21 }
 0x132   : > { %v530_v23 = vpop.f32.mrf.mxu0 }
 0x133   : > { %v531_v24 = vadd.f32 %v913_v22, %v530_v23 }
 0x134   : > { %v973_v25 = vpop.f32.mrf.mxu0 }
 0x135   : > { %1007 = vmatmul.mubr.f32.vlgmr.msra.gmra.mxu1 %v531_v24 }
 0x1f5   : > { %v607_v27 = vpop.f32.mrf.mxu1 }
 0x1f6   : > { %v608_v28 = vadd.f32 %v915_v26, %v607_v27 }
 0x1f7   : > { %v1008_v29 = vpop.f32.mrf.mxu1 }
 0x1f8   : > { %611 = vmax.xlane.f32.xlu0 %v608_v28 }
 0x281   : > { %v612_v38 = vpop.xlane.xlu0 %611 }
 0x282   : > { %v613_v39 = vsub.f32 %v608_v28, %v612_v38 }
 0x284   : > { %v614_v40 = vmul.f32 1.442695, %v613_v39 }
 0x286   : > { %1136 = vpow2.f32 %v614_v40 }
 0x293   : > { %v1137_v41 = vpop.eup %1136 }
 0x294   : > { %616 = vadd.xlane.f32.xlu0 %v1137_v41 }
 0x31d   : > { %v617_v50 = vpop.xlane.xlu0 %616 }
 0x31e   : > { %1138 = vrcp.f32 %v617_v50 }
 0x32b   : > { %v1139_v51 = vpop.eup %1138 }
 0x32c   : > { %v620_v52 = vmul.f32 %v1139_v51, %v1137_v41 }
 0x32e   : > { %1042 = vmatmul.mubr.f32.vlgmr.msra.gmra.mxu0 %v620_v52  ;;  %692 = vst [vmem:[%s415_s12] sm:$0xff] %v620_v52 }
 0x32f   : > { %1263 = shalt.err (!%p1260_p4)
}
 0x330   : > { %s1264_s8 = scalar_lea.hbm %s725_s17, 128  ;;  %s1268_s9 = scalar_lea.hbm %s1768_s7, 256 }
 0x331   : > { %p1265_p8 = scmp.ne.s32.totalorder %s725_s17, %s1264_s8  ;;  %p1269_p7 = scmp.lt.s32.totalorder %s725_s17, %s1768_s7 }
 0x332   : > { %p1270_p2 = scmp.lt.s32.totalorder %s1268_s9, %s1264_s8 }
 0x333   : > { %p1266_p5 = pnand %p1265_p8, %p1516_p12 }
 0x334   : > { %p1271_p11 = por %p1270_p2, %p1269_p7 }
 0x335   : > { %p1267_p0 = pneg %p1266_p5 }
 0x337   : > { %p1272_p1 = pnand %p1271_p11, %p1267_p0 }
 0x339   : > { %1275 = shalt.err (!%p1272_p1)
}
 0x33a   : > { %1055 = dma.vmem_to_hbm [thread:$0]  (%p1516_p12), %s728_s28, 128, %s725_s17, %s699_s0  }
 0x33b   : > { %s408_s19 = scalar_lea.vmem [#allocation10], %s1583_s1  ;;  %s1715_s13 = scalar_lea.hbm %s1767_s6, %s918_s26 }
 0x33c   : > { %s713_s12 = sshll.u32 %s408_s19, 4  ;;  %s694_s23 = scalar_lea.sflag [#allocation4], %s1580_s30  ;;  %s1708_s12 = int_to_ptr.vmem [resolvable:$true] %s713_s12 }
 0x33d   : > { %s1276_s21 = scalar_lea.vmem %s1708_s12, 128  ;;  %s1379_s1 = smov [#allocation10]  }
 0x33e   : > { %p1277_p3 = scmp.ne.s32.totalorder %s1708_s12, %s1276_s21  ;;  %s1280_s17 = sshll.u32 %s1379_s1, 4  ;;  %s1281_s17 = int_to_ptr.vmem [resolvable:$false] %s1280_s17 }
 0x33f   : > { %s1282_s27 = scalar_lea.vmem %s1281_s17, 256  ;;  %p1283_p10 = scmp.lt.s32.totalorder %s1708_s12, %s1281_s17 }
 0x340   : > { %p1278_p6 = pnand %p1277_p3, %p1516_p12  ;;  %p1284_p4 = scmp.lt.s32.totalorder %s1282_s27, %s1276_s21 }
 0x342   : > { %p1279_p9 = pneg %p1278_p6  ;;  %p1285_p8 = por %p1284_p4, %p1283_p10 }
 0x344   : > { %p1286_p5 = pnand %p1285_p8, %p1279_p9 }
 0x3ee   : > { %v687_v53 = vpop.f32.mrf.mxu0 }
 0x3ef   : > { %691 = vst [vmem:[%s408_s19] sm:$0xff] %v687_v53 }
 0x3f0   : > { %v1043_v54 = vpop.f32.mrf.mxu0 }
 0x3f1   : > { %1289 = shalt.err (!%p1286_p5)
}
 0x3f2   : > { %s1290_s26 = scalar_lea.hbm %s1715_s13, 128  ;;  %s1294_s0 = scalar_lea.hbm %s1767_s6, 256 }
 0x3f3   : > { %p1291_p0 = scmp.ne.s32.totalorder %s1715_s13, %s1290_s26  ;;  %p1295_p11 = scmp.lt.s32.totalorder %s1715_s13, %s1767_s6 }
 0x3f4   : > { %p1296_p1 = scmp.lt.s32.totalorder %s1294_s0, %s1290_s26 }
 0x3f5   : > { %p1292_p7 = pnand %p1291_p0, %p1516_p12 }
 0x3f6   : > { %p1297_p3 = por %p1296_p1, %p1295_p11 }
 0x3f7   : > { %p1293_p2 = pneg %p1292_p7 }
 0x3f9   : > { %p1298_p6 = pnand %p1297_p3, %p1293_p2 }
 0x3fb   : > { %1301 = shalt.err (!%p1298_p6)
}
 0x3fc   : > { %1054 = dma.vmem_to_hbm [thread:$0]  (%p1516_p12), %s1708_s12, 128, %s1715_s13, %s694_s23  }
 0x3fd PF: > { %s739_s20 = sand.u32 1, %s1348_s24   ;;  %p1800_p9 = scmp.ge.s32.totalorder %s1368_s29, 2 }
 0x3fe   : > { %s740_s2 = scalar_lea.sflag [#allocation4], %s739_s20 }
 0x3ff   : > { %p1073_p10 = pnand %p1800_p9, %p1520_p13 }
 0x401   : > { %p1074_p4 = pneg %p1073_p10 }
 0x403   : > { %1339 = dma.done.wait (%p1074_p4), %s740_s2, 128  }
 0x404   : > { %1341 = vsyncadd (%p1074_p4), %s740_s2, 4294967168  ;;  %s749_s9 = scalar_lea.sflag [#allocation12], %s739_s20 }
 0x405   : > { %1343 = dma.done.wait (%p1074_p4), %s749_s9, 128  }
 0x406   : > { %1345 = vsyncadd (%p1074_p4), %s749_s9, 4294967168  ;;  %s31_s29 = sadd.s32 1, %s1368_s29   ;;  %s1801_s14 = sld [smem:[#allocation18_spill]] }
 0x407   : > { %p28_p8 = scmp.ge.s32.totalorder %s31_s29, 4   ;;  %s1802_s26 = sld [smem:[#allocation21_spill]] }
 0x408   : > { %s1803_s27 = sld [smem:[#allocation19_spill]]  ;;  %s1805_s24 = smov %s1352_s25 }
 0x409   : > { %s1804_s28 = sld [smem:[#allocation20_spill]]  ;;  %30 = sbr.rel (!%p28_p8) target bundleno = 15 (0xf), region = 134 }
 0x40c   : > { %s1806_s25 = smov %s1801_s14 }
 0x40e   :  { %754 = vsyncpa [#allocation3], 1 }
 0x40f   :  { %756 = vsyncpa [#allocation3 + $0x1], 1 }
 0x410   :  { %757 = vsyncpa [#allocation6], 1 }
 0x411   :  { %759 = vsyncpa [#allocation6 + $0x1], 1 }
 0x412   :  { %760 = vsyncpa [#allocation9], 1 }
 0x413   :  { %761 = vsyncpa [#allocation4], 1 }
 0x414   :  { %763 = vsyncpa [#allocation4 + $0x1], 1 }
 0x415   :  { %764 = vsyncpa [#allocation12], 1 }
 0x416   :  { %766 = vsyncpa [#allocation12 + $0x1], 1 }

</bundles_post_ra>
